<compile_context>
chip_gen: v7x
topology: tpu7x:2x2x1
jax: 0.10.0
libtpu: 0.0.40
codegen_flags: <defaults>
</compile_context>

<pallas_src>
import functools

import jax
import jax.numpy as jnp
from jax import lax
from jax.experimental import pallas as pl
from jax.experimental.pallas import tpu as pltpu


def _dro_loss_kernel(ab_ref, p_ref, nmt_ref, out_ref, w_sc, m_sc, *, A, N, K):
    # ab_ref, p_ref : (tile_a, tile_k)  abnormal scores / weights, K on lanes
    # nmt_ref       : (tile_k, tile_n)  normal scores (transposed), K on sublanes
    # out_ref       : (1, 1, 1, tile_n) per-(a-tile, n-tile) partial hinge sums
    # w_sc          : (tile_a, 1) f32   running sum_k p*ab for this a-tile
    # m_sc          : (1, tile_n) f32   running max_k normal for this n-tile
    tile_a, tile_k = ab_ref.shape
    tile_n = nmt_ref.shape[1]

    ai = pl.program_id(0)
    ni = pl.program_id(1)
    ki = pl.program_id(2)
    nk = pl.num_programs(2)

    @pl.when(ki == 0)
    def _init():
        w_sc[...] = jnp.zeros_like(w_sc)
        m_sc[...] = jnp.full_like(m_sc, -jnp.inf)

    # K-validity masks (K may not divide tile_k; padded block entries are garbage).
    k_base = ki * tile_k
    k_lane = lax.broadcasted_iota(jnp.int32, (1, tile_k), 1) + k_base   # (1, tile_k)
    k_sub = lax.broadcasted_iota(jnp.int32, (tile_k, 1), 0) + k_base    # (tile_k, 1)

    # Weighted-sum partials (VPU mul + XLU lane reduce; cast to f32 on load).
    ab = ab_ref[...].astype(jnp.float32)
    pv = p_ref[...].astype(jnp.float32)
    prod = jnp.where(k_lane < K, pv * ab, 0.0)                          # (tile_a, tile_k)
    w_sc[...] = w_sc[...] + jnp.sum(prod, axis=1, keepdims=True)        # (tile_a, 1)

    # Running max partials (masked -inf so zero/garbage padding never wins).
    nm = jnp.where(k_sub < K, nmt_ref[...].astype(jnp.float32), -jnp.inf)  # (tile_k, tile_n)
    m_sc[...] = jnp.maximum(m_sc[...], jnp.max(nm, axis=0, keepdims=True))  # (1, tile_n)

    @pl.when(ki == nk - 1)
    def _finalize():
        # Edge-tile row/col validity for A and N.
        a_idx = lax.broadcasted_iota(jnp.int32, (tile_a, 1), 0) + ai * tile_a
        n_idx = lax.broadcasted_iota(jnp.int32, (1, tile_n), 1) + ni * tile_n
        # Padded abnormal rows -> +inf, padded normal cols -> -inf: hinge term 0.
        w_col = jnp.where(a_idx < A, w_sc[...], jnp.inf)                 # (tile_a, 1)
        m1_row = jnp.where(n_idx < N, m_sc[...] + 1.0, -jnp.inf)         # (1, tile_n)
        # Pairwise hinge: pure VPU (one sub + one max per element), no transpose.
        d = jnp.maximum(m1_row - w_col, 0.0)                             # (tile_a, tile_n)
        part = jnp.sum(d, axis=0, keepdims=True)                         # (1, tile_n), lane-dense
        out_ref[...] = part.reshape(out_ref.shape)


def dro_loss(abnormal_outputs, normal_outputs, p_values, gamma=1.0,
             *, tile_a=256, tile_n=256, tile_k=512):
    # gamma is unused in the reference forward pass (kept for API fidelity).
    del gamma
    A, K = abnormal_outputs.shape
    N, Kn = normal_outputs.shape
    assert Kn == K and p_values.shape == (A, K)

    # Tile selection subject to TPU (8, 128) block rules:
    #   ab/p blocks (tile_a, tile_k): tile_a %8 or ==A ; tile_k %128 or ==K
    #   nm_t blocks (tile_k, tile_n): tile_k %8  or ==K ; tile_n %128 or ==N
    tile_a = A if A <= tile_a else tile_a
    tile_n = N if N <= tile_n else tile_n
    tile_k = K if K <= tile_k else tile_k
    if tile_a < A:
        assert tile_a % 8 == 0
    if tile_n < N:
        assert tile_n % 128 == 0
    if tile_k < K:
        assert tile_k % 128 == 0

    a_t = pl.cdiv(A, tile_a)
    n_t = pl.cdiv(N, tile_n)
    k_t = pl.cdiv(K, tile_k)

    # Layout plumbing: normal rows on the lane axis -> lane-dense hinge output,
    # no in-kernel transpose needed.
    normal_t = jnp.transpose(normal_outputs)                              # (K, N)

    kernel = functools.partial(_dro_loss_kernel, A=A, N=N, K=K)

    # VMEM budget: double-buffered input blocks + tiny scratch/output + headroom;
    # capped at 48 MiB so it is safe even on v7x's 64 MiB physical VMEM.
    esz = 4
    blk_bytes = (2 * tile_a * tile_k + tile_k * tile_n) * esz
    vmem_limit = int(min(max(4 * blk_bytes + (2 << 20), 16 << 20), 48 << 20))

    partials = pl.pallas_call(
        kernel,
        out_shape=jax.ShapeDtypeStruct((a_t, n_t, 1, tile_n), jnp.float32),
        grid=(a_t, n_t, k_t),
        in_specs=[
            pl.BlockSpec((tile_a, tile_k), lambda ai, ni, ki: (ai, ki)),  # abnormal
            pl.BlockSpec((tile_a, tile_k), lambda ai, ni, ki: (ai, ki)),  # p_values
            pl.BlockSpec((tile_k, tile_n), lambda ai, ni, ki: (ki, ni)),  # normal^T
        ],
        out_specs=pl.BlockSpec((1, 1, 1, tile_n),
                               lambda ai, ni, ki: (ai, ni, 0, 0)),
        scratch_shapes=[
            pltpu.VMEM((tile_a, 1), jnp.float32),   # w accumulator
            pltpu.VMEM((1, tile_n), jnp.float32),   # m accumulator
        ],
        compiler_params=pltpu.CompilerParams(
            dimension_semantics=("parallel", "parallel", "arbitrary"),
            vmem_limit_bytes=vmem_limit),
    )(abnormal_outputs, p_values, normal_t)

    # Tiny epilogue: total hinge sum scaled once by 1/(N*A).
    return jnp.sum(partials) * (1.0 / (N * A))


def dro_loss_ref(abnormal_outputs, normal_outputs, p_values):
    # Pure-JAX reference mirroring the PyTorch loops.
    A = abnormal_outputs.shape[0]
    N = normal_outputs.shape[0]
    w = jnp.sum(p_values * abnormal_outputs, axis=1)     # [A]
    m = jnp.max(normal_outputs, axis=1)                  # [N]
    d = jnp.maximum(1.0 - w[None, :] + m[:, None], 0.0)  # [N, A]
    return jnp.sum(d) / (N * A)


if __name__ == "__main__":
    def make_inputs(key, A, N, K):
        k1, k2, k3 = jax.random.split(key, 3)
        ab = jax.random.normal(k1, (A, K), dtype=jnp.float32)
        nm = jax.random.normal(k2, (N, K), dtype=jnp.float32)
        p_raw = jax.random.uniform(k3, (A, K), dtype=jnp.float32)
        p = p_raw / jnp.sum(p_raw, axis=1, keepdims=True)
        return ab, nm, p

    # Case 1: small single-tile shapes (A=8 abnormal, N=8 normal, K=128 scores).
    ab, nm, p = make_inputs(jax.random.PRNGKey(0), 8, 8, 128)
    out = jax.block_until_ready(dro_loss(ab, nm, p, gamma=0.1))
    ref = dro_loss_ref(ab, nm, p)
    assert jnp.allclose(out, ref, rtol=1e-4, atol=1e-5), (out, ref)

    # Case 2: exercises K-reduction tiling, accumulators, and edge-tile masking
    # on all three axes (A=20, N=132, K=300 with small tiles).
    ab2, nm2, p2 = make_inputs(jax.random.PRNGKey(1), 20, 132, 300)
    out2 = jax.block_until_ready(
        dro_loss(ab2, nm2, p2, gamma=0.1, tile_a=8, tile_n=128, tile_k=128))
    ref2 = dro_loss_ref(ab2, nm2, p2)
    assert jnp.allclose(out2, ref2, rtol=1e-4, atol=1e-5), (out2, ref2)

    print("KERNEL_OK")
</pallas_src>

<mosaic_0001>
module attributes {stable_mosaic.version = 11 : i64} {
  func.func @_dro_loss_kernel(%arg0: i32, %arg1: i32, %arg2: i32, %arg3: memref<8x128xf32, #tpu.memory_space<vmem>>, %arg4: memref<8x128xf32, #tpu.memory_space<vmem>>, %arg5: memref<128x8xf32, #tpu.memory_space<vmem>>, %arg6: memref<1x1x1x8xf32, #tpu.memory_space<vmem>>, %arg7: memref<8x1xf32, #tpu.memory_space<vmem>>, %arg8: memref<1x8xf32, #tpu.memory_space<vmem>>) attributes {dimension_semantics = [#tpu.dimension_semantics<parallel>, #tpu.dimension_semantics<parallel>, #tpu.dimension_semantics<arbitrary>], iteration_bounds = array<i64: 1, 1, 1>, scalar_prefetch = 0 : i64, scratch_operands = 2 : i64, tpu.core_type = #tpu.core_type<tc>, window_params = [{transform_indices = @transform_0, window_bounds = array<i64: 8, 128>}, {transform_indices = @transform_1, window_bounds = array<i64: 8, 128>}, {transform_indices = @transform_2, window_bounds = array<i64: 128, 8>}, {transform_indices = @transform_3, window_bounds = array<i64: 1, 1, 1, 8>}]} {
    %c0_i32 = arith.constant 0 : i32
    %0 = arith.cmpi eq, %arg2, %c0_i32 : i32
    %1 = arith.extui %0 : i1 to i32
    %c0_i32_0 = arith.constant 0 : i32
    %2 = arith.cmpi ne, %1, %c0_i32_0 : i32
    scf.if %2 {
      %cst_21 = arith.constant 0.000000e+00 : f32
      %39 = vector.broadcast %cst_21 : f32 to vector<8x1xf32>
      %c0_22 = arith.constant 0 : index
      %c0_23 = arith.constant 0 : index
      %40 = vector.load %arg7[%c0_22, %c0_23] : memref<8x1xf32, #tpu.memory_space<vmem>>, vector<8x1xf32>
      tpu.vector_store %arg7[%c0_22, %c0_23], %39 {strides = array<i32>} : memref<8x1xf32, #tpu.memory_space<vmem>>, vector<8x1xf32>,
      %cst_24 = arith.constant 0xFF800000 : f32
      %41 = vector.broadcast %cst_24 : f32 to vector<1x8xf32>
      %c0_25 = arith.constant 0 : index
      %c0_26 = arith.constant 0 : index
      %42 = vector.load %arg8[%c0_25, %c0_26] : memref<1x8xf32, #tpu.memory_space<vmem>>, vector<1x8xf32>
      tpu.vector_store %arg8[%c0_25, %c0_26], %41 {strides = array<i32>} : memref<1x8xf32, #tpu.memory_space<vmem>>, vector<1x8xf32>,
    } else {
    }
    %c128_i32 = arith.constant 128 : i32
    %3 = arith.muli %arg2, %c128_i32 : i32
    %4 = tpu.iota {dimensions = array<i32: 1>} : vector<1x128xi32>
    %5 = vector.broadcast %3 : i32 to vector<1x128xi32>
    %6 = arith.addi %4, %5 : vector<1x128xi32>
    %7 = tpu.iota {dimensions = array<i32: 0>} : vector<128x1xi32>
    %8 = vector.broadcast %3 : i32 to vector<128x1xi32>
    %9 = arith.addi %7, %8 : vector<128x1xi32>
    %c0 = arith.constant 0 : index
    %c0_1 = arith.constant 0 : index
    %10 = vector.load %arg3[%c0, %c0_1] : memref<8x128xf32, #tpu.memory_space<vmem>>, vector<8x128xf32>
    %c0_2 = arith.constant 0 : index
    %c0_3 = arith.constant 0 : index
    %11 = vector.load %arg4[%c0_2, %c0_3] : memref<8x128xf32, #tpu.memory_space<vmem>>, vector<8x128xf32>
    %c128_i32_4 = arith.constant 128 : i32
    %12 = vector.broadcast %c128_i32_4 : i32 to vector<1x128xi32>
    %13 = arith.cmpi slt, %6, %12 : vector<1x128xi32>
    %14 = arith.mulf %11, %10 : vector<8x128xf32>
    %cst = arith.constant 0.000000e+00 : f32
    %15 = vector.shape_cast %13 : vector<1x128xi1> to vector<1x128xi1>
    %16 = vector.broadcast %15 : vector<1x128xi1> to vector<8x128xi1>
    %17 = vector.broadcast %cst : f32 to vector<8x128xf32>
    %18 = arith.select %16, %14, %17 : vector<8x128xi1>, vector<8x128xf32>
    %c0_5 = arith.constant 0 : index
    %c0_6 = arith.constant 0 : index
    %19 = vector.load %arg7[%c0_5, %c0_6] : memref<8x1xf32, #tpu.memory_space<vmem>>, vector<8x1xf32>
    %cst_7 = arith.constant dense<0.000000e+00> : vector<8xf32>
    %20 = vector.multi_reduction <add>, %18, %cst_7 [1] : vector<8x128xf32> to vector<8xf32>
    %21 = vector.shape_cast %20 : vector<8xf32> to vector<8x1xf32>
    %22 = arith.addf %19, %21 : vector<8x1xf32>
    %c0_8 = arith.constant 0 : index
    %c0_9 = arith.constant 0 : index
    %23 = vector.load %arg7[%c0_8, %c0_9] : memref<8x1xf32, #tpu.memory_space<vmem>>, vector<8x1xf32>
    tpu.vector_store %arg7[%c0_8, %c0_9], %22 {strides = array<i32>} : memref<8x1xf32, #tpu.memory_space<vmem>>, vector<8x1xf32>,
    %c128_i32_10 = arith.constant 128 : i32
    %24 = vector.broadcast %c128_i32_10 : i32 to vector<128x1xi32>
    %25 = arith.cmpi slt, %9, %24 : vector<128x1xi32>
    %c0_11 = arith.constant 0 : index
    %c0_12 = arith.constant 0 : index
    %26 = vector.load %arg5[%c0_11, %c0_12] : memref<128x8xf32, #tpu.memory_space<vmem>>, vector<128x8xf32>
    %cst_13 = arith.constant 0xFF800000 : f32
    %27 = vector.shape_cast %25 : vector<128x1xi1> to vector<128x1xi1>
    %28 = vector.broadcast %27 : vector<128x1xi1> to vector<128x8xi1>
    %29 = vector.broadcast %cst_13 : f32 to vector<128x8xf32>
    %30 = arith.select %28, %26, %29 : vector<128x8xi1>, vector<128x8xf32>
    %c0_14 = arith.constant 0 : index
    %c0_15 = arith.constant 0 : index
    %31 = vector.load %arg8[%c0_14, %c0_15] : memref<1x8xf32, #tpu.memory_space<vmem>>, vector<1x8xf32>
    %cst_16 = arith.constant dense<0xFF800000> : vector<8xf32>
    %32 = vector.multi_reduction <maximumf>, %30, %cst_16 [0] : vector<128x8xf32> to vector<8xf32>
    %33 = vector.shape_cast %32 : vector<8xf32> to vector<1x8xf32>
    %34 = arith.maximumf %31, %33 : vector<1x8xf32>
    %c0_17 = arith.constant 0 : index
    %c0_18 = arith.constant 0 : index
    %35 = vector.load %arg8[%c0_17, %c0_18] : memref<1x8xf32, #tpu.memory_space<vmem>>, vector<1x8xf32>
    tpu.vector_store %arg8[%c0_17, %c0_18], %34 {strides = array<i32>} : memref<1x8xf32, #tpu.memory_space<vmem>>, vector<1x8xf32>,
    %c0_i32_19 = arith.constant 0 : i32
    %36 = arith.cmpi eq, %arg2, %c0_i32_19 : i32
    %37 = arith.extui %36 : i1 to i32
    %c0_i32_20 = arith.constant 0 : i32
    %38 = arith.cmpi ne, %37, %c0_i32_20 : i32
    scf.if %38 {
      %39 = tpu.iota {dimensions = array<i32: 0>} : vector<8x1xi32>
      %c8_i32 = arith.constant 8 : i32
      %40 = arith.muli %arg0, %c8_i32 : i32
      %41 = vector.broadcast %40 : i32 to vector<8x1xi32>
      %42 = arith.addi %39, %41 : vector<8x1xi32>
      %43 = tpu.iota {dimensions = array<i32: 1>} : vector<1x8xi32>
      %c8_i32_21 = arith.constant 8 : i32
      %44 = arith.muli %arg1, %c8_i32_21 : i32
      %45 = vector.broadcast %44 : i32 to vector<1x8xi32>
      %46 = arith.addi %43, %45 : vector<1x8xi32>
      %c8_i32_22 = arith.constant 8 : i32
      %47 = vector.broadcast %c8_i32_22 : i32 to vector<8x1xi32>
      %48 = arith.cmpi slt, %42, %47 : vector<8x1xi32>
      %c0_23 = arith.constant 0 : index
      %c0_24 = arith.constant 0 : index
      %49 = vector.load %arg7[%c0_23, %c0_24] : memref<8x1xf32, #tpu.memory_space<vmem>>, vector<8x1xf32>
      %cst_25 = arith.constant 0x7F800000 : f32
      %50 = vector.broadcast %cst_25 : f32 to vector<8x1xf32>
      %51 = arith.select %48, %49, %50 : vector<8x1xi1>, vector<8x1xf32>
      %c8_i32_26 = arith.constant 8 : i32
      %52 = vector.broadcast %c8_i32_26 : i32 to vector<1x8xi32>
      %53 = arith.cmpi slt, %46, %52 : vector<1x8xi32>
      %c0_27 = arith.constant 0 : index
      %c0_28 = arith.constant 0 : index
      %54 = vector.load %arg8[%c0_27, %c0_28] : memref<1x8xf32, #tpu.memory_space<vmem>>, vector<1x8xf32>
      %cst_29 = arith.constant 1.000000e+00 : f32
      %55 = vector.broadcast %cst_29 : f32 to vector<1x8xf32>
      %56 = arith.addf %54, %55 : vector<1x8xf32>
      %cst_30 = arith.constant 0xFF800000 : f32
      %57 = vector.broadcast %cst_30 : f32 to vector<1x8xf32>
      %58 = arith.select %53, %56, %57 : vector<1x8xi1>, vector<1x8xf32>
      %59 = vector.broadcast %58 : vector<1x8xf32> to vector<8x8xf32>
      %60 = vector.broadcast %51 : vector<8x1xf32> to vector<8x8xf32>
      %61 = arith.subf %59, %60 : vector<8x8xf32>
      %cst_31 = arith.constant 0.000000e+00 : f32
      %62 = vector.broadcast %cst_31 : f32 to vector<8x8xf32>
      %63 = arith.maximumf %61, %62 : vector<8x8xf32>
      %cst_32 = arith.constant dense<0.000000e+00> : vector<8xf32>
      %64 = vector.multi_reduction <add>, %63, %cst_32 [0] : vector<8x8xf32> to vector<8xf32>
      %65 = vector.shape_cast %64 : vector<8xf32> to vector<1x8xf32>
      %66 = vector.shape_cast %65 : vector<1x8xf32> to vector<1x1x1x8xf32>
      %c0_33 = arith.constant 0 : index
      %c0_34 = arith.constant 0 : index
      %c0_35 = arith.constant 0 : index
      %c0_36 = arith.constant 0 : index
      %67 = vector.load %arg6[%c0_33, %c0_34, %c0_35, %c0_36] : memref<1x1x1x8xf32, #tpu.memory_space<vmem>>, vector<1x1x1x8xf32>
      tpu.vector_store %arg6[%c0_33, %c0_34, %c0_35, %c0_36], %66 {strides = array<i32>} : memref<1x1x1x8xf32, #tpu.memory_space<vmem>>, vector<1x1x1x8xf32>,
    } else {
    }
    return
  }
  func.func @transform_0(%arg0: i32, %arg1: i32, %arg2: i32) -> (i32, i32) {
    %c0_i32 = arith.constant 0 : i32
    return %arg0, %arg2 : i32, i32
  }
  func.func @transform_1(%arg0: i32, %arg1: i32, %arg2: i32) -> (i32, i32) {
    %c0_i32 = arith.constant 0 : i32
    return %arg0, %arg2 : i32, i32
  }
  func.func @transform_2(%arg0: i32, %arg1: i32, %arg2: i32) -> (i32, i32) {
    %c0_i32 = arith.constant 0 : i32
    return %arg2, %arg1 : i32, i32
  }
  func.func @transform_3(%arg0: i32, %arg1: i32, %arg2: i32) -> (i32, i32, i32, i32) {
    %c0_i32 = arith.constant 0 : i32
    %c0_i32_0 = arith.constant 0 : i32
    %c0_i32_1 = arith.constant 0 : i32
    return %arg0, %arg1, %c0_i32, %c0_i32_0 : i32, i32, i32, i32
  }
}

</mosaic_0001>

<bundles_post_ra>
// kernel: tpu_custom_call.1
= control target key start
LH: loop header
LB: loop body
LE: loop exit
PB: predicated region body
PF: predicated region fallthrough
CT: control target
= control target key end

     0   :  { %s386_s0 = inlined_call_operand.vmem [shape: f32[8,128], index: 0, kind: input, shape index: {}]   ;;  %s387_s1 = inlined_call_operand.vmem [shape: f32[8,128], index: 1, kind: input, shape index: {}]   ;;  %s388_s2 = inlined_call_operand.vmem [shape: f32[128,8], index: 2, kind: input, shape index: {}]   ;;  %s389_s3 = inlined_call_operand.hbm [shape: f32[1,1,1,8], index: 3, kind: output, shape index: {}]  }
   0x1   :  { %v61_v0 = vld [vmem:[%s386_s0] sm:$0xff] }
   0x2   :  { %v62_v1 = vld [vmem:[%s387_s1] sm:$0xff] }
   0x3   :  { %8 = vsyncpa [#allocation5], 0  ;;  %v64_v2 = vmul.f32 %v62_v1, %v61_v0  ;;  %vm19_vm0 = vcmask 7168   ;;  %v274_v3 = vmov 0.0   ;;  %v275_v4 = vmov 0   ;;  %v90_v5 = vld [vmem:[%s388_s2] sm:$0xff] }
   0x4   :  { %20 = vst.msk [vmem:[#allocation2] sm:$0xff] %vm19_vm0, %v274_v3  ;;  %249 = vset.pattern.permute.xlu0 %v275_v4  ;;  %vm21_vm1 = vcmask 57344   ;;  %v91_v6 = vld [vmem:[%s388_s2 + $0x8] sm:$0xff]  ;;  %v92_v7 = vld [vmem:[%s388_s2 + $0x10] sm:$0xff]  ;;  %vm155_vm2 = vcmask 64512   ;;  %v276_v8 = vmov -inf   ;;  %v24_v1 = vlaneseq }
   0x5   :  { %69 = vadd.xlane.f32.xlu0 %v64_v2  ;;  %22 = vst.msk [vmem:[#allocation3] sm:$0x1] %vm21_vm1, %v276_v8  ;;  %v93_v9 = vld [vmem:[%s388_s2 + $0x18] sm:$0xff]  ;;  %v94_v10 = vld [vmem:[%s388_s2 + $0x20] sm:$0xff]  ;;  %v95_v11 = vld [vmem:[%s388_s2 + $0x28] sm:$0xff]  ;;  %v156_v12 = vsel %vm155_vm2, %v90_v5, -inf }
   0x6   :  { %v157_v13 = vsel %vm155_vm2, %v91_v6, -inf  ;;  %v158_v14 = vsel %vm155_vm2, %v92_v7, -inf  ;;  %v96_v15 = vld [vmem:[%s388_s2 + $0x30] sm:$0xff]  ;;  %v97_v16 = vld [vmem:[%s388_s2 + $0x38] sm:$0xff]  ;;  %v98_v17 = vld [vmem:[%s388_s2 + $0x40] sm:$0xff]  ;;  %v159_v18 = vsel %vm155_vm2, %v93_v9, -inf }
   0x7   :  { %v160_v19 = vsel %vm155_vm2, %v94_v10, -inf  ;;  %v99_v20 = vld [vmem:[%s388_s2 + $0x48] sm:$0xff]  ;;  %v100_v21 = vld [vmem:[%s388_s2 + $0x50] sm:$0xff]  ;;  %v101_v22 = vld [vmem:[%s388_s2 + $0x58] sm:$0xff]  ;;  %v162_v24 = vsel %vm155_vm2, %v95_v11, -inf  ;;  %v164_v25 = vsel %vm155_vm2, %v96_v15, -inf }
   0x8   :  { %v161_v23 = vmax.f32 %v156_v12, %v160_v19  ;;  %v166_v26 = vsel %vm155_vm2, %v97_v16, -inf  ;;  %v102_v27 = vld [vmem:[%s388_s2 + $0x60] sm:$0xff]  ;;  %v103_v28 = vld [vmem:[%s388_s2 + $0x68] sm:$0xff]  ;;  %v104_v29 = vld [vmem:[%s388_s2 + $0x70] sm:$0xff]  ;;  %v163_v30 = vmax.f32 %v157_v13, %v162_v24  ;;  %v165_v31 = vmax.f32 %v158_v14, %v164_v25 }
   0x9   :  { %v167_v32 = vmax.f32 %v159_v18, %v166_v26  ;;  %v168_v33 = vsel %vm155_vm2, %v98_v17, -inf  ;;  %v105_v34 = vld [vmem:[%s388_s2 + $0x78] sm:$0xff]  ;;  %v170_v36 = vsel %vm155_vm2, %v99_v20, -inf  ;;  %v172_v37 = vsel %vm155_vm2, %v100_v21, -inf  ;;  %s277_s2 = smov [#allocation4]  }
   0xa   :  { %v169_v35 = vmax.f32 %v161_v23, %v168_v33  ;;  %v174_v38 = vsel %vm155_vm2, %v101_v22, -inf  ;;  %v171_v39 = vmax.f32 %v163_v30, %v170_v36  ;;  %v173_v40 = vmax.f32 %v165_v31, %v172_v37  ;;  %s237_s0 = sshll.u32 %s277_s2, 4  ;;  %s238_s0 = int_to_ptr.vmem [resolvable:$true] %s237_s0 }
   0xb   :  { %v175_v41 = vmax.f32 %v167_v32, %v174_v38  ;;  %v176_v42 = vsel %vm155_vm2, %v102_v27, -inf  ;;  %v178_v44 = vsel %vm155_vm2, %v103_v28, -inf  ;;  %v180_v45 = vsel %vm155_vm2, %v104_v29, -inf  ;;  %v68_v61 = vld [vmem:[#allocation2] sm:$0xff]  ;;  %s250_s19 = scalar_lea.vmem %s238_s0, 16  ;;  %s254_s1 = scalar_lea.vmem %s238_s0, 32 }
   0xc   :  { %v177_v43 = vmax.f32 %v169_v35, %v176_v42  ;;  %v182_v46 = vsel %vm155_vm2, %v105_v34, -inf  ;;  %v179_v47 = vmax.f32 %v171_v39, %v178_v44  ;;  %v181_v48 = vmax.f32 %v173_v40, %v180_v45  ;;  %v154_v58 = vld [vmem:[#allocation3] sm:$0x1]  ;;  %p251_p0 = scmp.ne.s32.totalorder %s238_s0, %s250_s19  ;;  %p255_p1 = scmp.lt.s32.totalorder %s238_s0, %s238_s0 }
   0xd   :  { %v183_v49 = vmax.f32 %v175_v41, %v182_v46  ;;  %v25_v2 = vand.u32 127, %v24_v1  ;;  %v213_v4 = vshrl.u32 %v24_v1, 7  ;;  %p256_p2 = scmp.lt.s32.totalorder %s254_s1, %s250_s19 }
   0xe   :  { %v184_v50 = vmax.f32 %v177_v43, %v179_v47 }
   0xf   :  { %v185_v51 = vmax.f32 %v181_v48, %v183_v49  ;;  %vm208_vm3 = vcmp.lt.s32.totalorder %v25_v2, 8  ;;  %v214_v6 = vsub.s32 0, %v213_v4  ;;  %p257_p3 = por %p256_p2, %p255_p1 }
  0x11   :  { %v186_v52 = vmax.f32 %v184_v50, %v185_v51  ;;  %p258_p4 = pnand %p257_p3, %p251_p0 }
  0x13   :  { %v187_v53 = vrot.slane %v186_v52, 4 }
  0x15   :  { %v188_v54 = vmax.f32 %v186_v52, %v187_v53 }
  0x17   :  { %v189_v55 = vrot.slane %v188_v54, 2 }
  0x19   :  { %v190_v56 = vmax.f32 %v188_v54, %v189_v55 }
  0x1b   :  { %v191_v57 = vrot.slane %v190_v56, 1 }
  0x1d   :  { %v192_v59 = vmax.f32 %v190_v56, %v191_v57 }
  0x1f   :  { %v193_v60 = vmax.f32 %v154_v58, %v192_v59 }
  0x21   :  { %195 = vst.msk [vmem:[#allocation3] sm:$0x1] %vm21_vm1, %v193_v60 }
  0x28   :  { %v209_v3 = vld [vmem:[#allocation3] sm:$0x1] }
  0x29   :  { %v210_v5 = vadd.f32 1.0, %v209_v3 }
  0x2b   :  { %v211_v7 = vsel %vm208_vm3, %v210_v5, -inf }
  0x2c   :  { %v215_v8 = vrot.slane %v211_v7, %v214_v6 }
  0x92   :  { %v70_v62 = vpop.xlane.xlu0 %69 }
  0x93   :  { %v71_v63 = vadd.f32 %v70_v62, %v68_v61 }
  0x95   :  { %73 = vst.msk [vmem:[#allocation2] sm:$0xff] %vm19_vm0, %v71_v63 }
  0x9c   :  { %v206_v0 = vld [vmem:[#allocation2] sm:$0xff] }
  0x9d   :  { %218 = vperm.xlu0 %249, %v206_v0  }
 0x11c   :  { %v219_v9 = vpop.permute.xlu0 %218 }
 0x11d   :  { %v221_v10 = vsub.f32 %v215_v8, %v219_v9 }
 0x11f   :  { %v222_v11 = vmax.f32 %v221_v10, 0.0 }
 0x121   :  { %v223_v12 = vsel %vm155_vm2, %v222_v11, 0.0 }
 0x122   :  { %v224_v13 = vrot.slane %v223_v12, 4 }
 0x124   :  { %v225_v14 = vadd.f32 %v224_v13, %v223_v12 }
 0x126   :  { %v226_v15 = vrot.slane %v225_v14, 2 }
 0x128   :  { %v227_v16 = vadd.f32 %v226_v15, %v225_v14 }
 0x12a   :  { %v228_v17 = vrot.slane %v227_v16, 1 }
 0x12c   :  { %v229_v18 = vadd.f32 %v228_v17, %v227_v16 }
 0x12e   :  { %230 = vst.msk [vmem:[#allocation4] sm:$0x1] %vm21_vm1, %v229_v18 }
 0x12f   :  { %261 = shalt.err (!%p258_p4)
}
 0x130   :  { %s262_s22 = scalar_lea.hbm %s389_s3, 16 }
 0x131   :  { %p263_p5 = scmp.ne.s32.totalorder %s389_s3, %s262_s22  ;;  %p266_p6 = scmp.lt.u32.totalorder %s262_s22, %s389_s3 }
 0x133   :  { %p268_p7 = pnand %p266_p6, %p263_p5 }
 0x135   :  { %271 = shalt.err (!%p268_p7)
}
 0x136   :  { %240 = dma.vmem_to_hbm [thread:$0]  %s238_s0, 16, %s389_s3, [#allocation5]  }
 0x137   :  { %272 = dma.done.wait [#allocation5], 16  }
 0x138   :  { %273 = vsyncadd [#allocation5], 4294967280 }
 0x139   :  { %244 = vsyncpa [#allocation5], 1 }

</bundles_post_ra>
